<compile_context>
chip_gen: v6e
topology: v6e:2x2x1
jax: 0.10.0
libtpu: 0.0.40
codegen_flags: <defaults>
</compile_context>

<pallas_src>
import jax
import jax.numpy as jnp
from jax import lax
from jax.experimental import pallas as pl
from jax.experimental.pallas import tpu as pltpu


def _round_up(n, m):
    return ((n + m - 1) // m) * m


def _qnet_kernel(x_ref, a_ref, w1x_ref, w1a_ref, b1_ref, w2_ref, b2_ref,
                 w3_ref, b3_ref, out_ref):
    # ---- fc1 + ReLU: two K-split bf16 MXU passes into one f32 accumulator
    # (replaces the wrapper-side concat([x, a])).
    h1 = jnp.dot(x_ref[...], w1x_ref[...], preferred_element_type=jnp.float32)
    h1 = h1 + jnp.dot(a_ref[...], w1a_ref[...],
                      preferred_element_type=jnp.float32)
    h1 = jnp.maximum(h1 + b1_ref[...], 0.0)                      # f32 (tb, hp)

    # ---- fc2 + ReLU
    h2 = jnp.dot(h1.astype(w2_ref.dtype), w2_ref[...],
                 preferred_element_type=jnp.float32)
    h2 = jnp.maximum(h2 + b2_ref[...], 0.0)                      # f32 (tb, hp)

    # ---- fc_out (out_features == 1): contract hidden against the single W3
    # row with a trans_b dot_general so the result comes out directly as a
    # lane-dense (1, tb) row (no (tb,1) masked stores, no explicit transpose).
    q_row = lax.dot_general(
        w3_ref[...], h2.astype(w3_ref.dtype),
        dimension_numbers=(((1,), (1,)), ((), ())),
        preferred_element_type=jnp.float32)                      # (1, tb)
    q_row = q_row + b3_ref[0]                                    # SMEM scalar
    out_ref[...] = q_row[None].astype(out_ref.dtype)             # (1, 1, tb)


def qvalue_net_forward(x, a, params, *, block_b=1024):
    """x: (B, state_dim), a: (B, action_dim). Returns (B, 1) float32 Q-values."""
    w1, b1, w2, b2, w3, b3 = (params["w1"], params["b1"], params["w2"],
                              params["b2"], params["w3"], params["b3"])
    B, state_dim = x.shape
    action_dim = a.shape[1]
    in1, hidden = w1.shape
    assert in1 == state_dim + action_dim

    # Widen the hidden (lane) dim to a multiple of 128: zero padding keeps the
    # math identical (padded h1/h2 columns are relu(0)=0; padded W2/W3 are 0).
    hp = _round_up(hidden, 128)
    dh = hp - hidden
    if dh:
        w1 = jnp.pad(w1, ((0, 0), (0, dh)))
        b1 = jnp.pad(b1, ((0, dh),))
        w2 = jnp.pad(w2, ((0, dh), (0, dh)))
        b2 = jnp.pad(b2, ((0, dh),))
        w3 = jnp.pad(w3, ((0, dh), (0, 0)))

    # bf16 weights / streamed activations; biases and accumulation stay f32.
    w1x = w1[:state_dim].astype(jnp.bfloat16)          # (state_dim, hp)
    w1a = w1[state_dim:].astype(jnp.bfloat16)          # (action_dim, hp)
    w2b = w2.astype(jnp.bfloat16)                      # (hp, hp)
    w3r = w3.reshape(1, hp).astype(jnp.bfloat16)       # (1, hp) lane-major row
    b1r = b1.reshape(1, hp).astype(jnp.float32)
    b2r = b2.reshape(1, hp).astype(jnp.float32)
    b3s = b3.reshape(1).astype(jnp.float32)            # scalar, lives in SMEM

    xb = x.astype(jnp.bfloat16)
    ab = a.astype(jnp.bfloat16)

    # Batch tile: multiple of 16 sublanes (bf16 packing); >=2 tiles whenever B
    # allows so v7x can shard the "parallel" axis across both TensorCores.
    tb = max(16, min(block_b, _round_up(-(-B // 2), 16)))
    b_pad = _round_up(B, tb)
    if b_pad != B:                                      # pad only a ragged tail
        xb = jnp.pad(xb, ((0, b_pad - B), (0, 0)))
        ab = jnp.pad(ab, ((0, b_pad - B), (0, 0)))
    grid_b = b_pad // tb

    def resident(shape):
        nd = len(shape)
        # Constant index_map: DMA'd once, stays resident in VMEM across steps.
        return pl.BlockSpec(shape, lambda i, _nd=nd: (0,) * _nd)

    # VMEM budget: resident bf16 weights + double-buffered x/a/out tiles.
    # Only raise the scoped limit when needed; cap below v7x's 64 MiB physical.
    vmem_need = (2 * (in1 * hp + hp * hp + hp) + 4 * 2 * hp
                 + 2 * 2 * tb * in1 + 2 * 4 * tb)
    vmem_kwargs = {}
    if vmem_need > 12 * (1 << 20):
        vmem_kwargs["vmem_limit_bytes"] = int(min(2 * vmem_need, 60 * (1 << 20)))

    out = pl.pallas_call(
        _qnet_kernel,
        out_shape=jax.ShapeDtypeStruct((grid_b, 1, tb), jnp.float32),
        grid=(grid_b,),
        in_specs=[
            pl.BlockSpec((tb, state_dim), lambda i: (i, 0)),    # x: streamed
            pl.BlockSpec((tb, action_dim), lambda i: (i, 0)),   # a: streamed
            resident((state_dim, hp)),                          # W1[:state]
            resident((action_dim, hp)),                         # W1[state:]
            resident((1, hp)),                                  # b1
            resident((hp, hp)),                                 # W2
            resident((1, hp)),                                  # b2
            resident((1, hp)),                                  # W3 row
            pl.BlockSpec(memory_space=pltpu.MemorySpace.SMEM),  # b3 scalar
        ],
        out_specs=pl.BlockSpec((1, 1, tb), lambda i: (i, 0, 0)),
        compiler_params=pltpu.CompilerParams(
            dimension_semantics=("parallel",), **vmem_kwargs),
    )(xb, ab, w1x, w1a, b1r, w2b, b2r, w3r, b3s)

    return out.reshape(b_pad, 1)[:B]


def init_params(key, state_dim, hidden_dim, action_dim):
    """Deterministic init mimicking nn.Linear's U(-1/sqrt(fan_in), 1/sqrt(fan_in)).
    Weights are stored as (in_features, out_features) — i.e. PyTorch weight.T."""
    k1, k2, k3, k4, k5, k6 = jax.random.split(key, 6)
    in1 = state_dim + action_dim

    def u(k, shape, fan_in):
        bound = 1.0 / jnp.sqrt(jnp.float32(fan_in))
        return jax.random.uniform(k, shape, jnp.float32, -bound, bound)

    return {
        "w1": u(k1, (in1, hidden_dim), in1),
        "b1": u(k2, (hidden_dim,), in1),
        "w2": u(k3, (hidden_dim, hidden_dim), hidden_dim),
        "b2": u(k4, (hidden_dim,), hidden_dim),
        "w3": u(k5, (hidden_dim, 1), hidden_dim),
        "b3": u(k6, (1,), hidden_dim),
    }


def _reference_forward(x, a, params):
    cat = jnp.concatenate([x, a], axis=1)
    h1 = jax.nn.relu(cat @ params["w1"] + params["b1"])
    h2 = jax.nn.relu(h1 @ params["w2"] + params["b2"])
    return h2 @ params["w3"] + params["b3"]


if __name__ == "__main__":
    state_dim, hidden_dim, action_dim = 12, 32, 4

    key = jax.random.PRNGKey(0)
    kp, kx1, ka1, kx2, ka2 = jax.random.split(key, 5)
    params = init_params(kp, state_dim, hidden_dim, action_dim)

    # Small batch (single grid step, batch padded 8 -> 16).
    B1 = 8
    x1 = jax.random.normal(kx1, (B1, state_dim), jnp.float32)
    a1 = jax.random.normal(ka1, (B1, action_dim), jnp.float32)
    out1 = jax.block_until_ready(qvalue_net_forward(x1, a1, params))
    ref1 = _reference_forward(x1, a1, params)
    assert out1.shape == (B1, 1), out1.shape
    # bf16 weights/activations -> looser tolerance vs. the f32 reference.
    assert jnp.allclose(out1, ref1, atol=5e-2, rtol=5e-2), (out1, ref1)

    # Larger batch: multiple grid steps + ragged-tail padding.
    B2 = 272
    x2 = jax.random.normal(kx2, (B2, state_dim), jnp.float32)
    a2 = jax.random.normal(ka2, (B2, action_dim), jnp.float32)
    out2 = jax.block_until_ready(qvalue_net_forward(x2, a2, params, block_b=64))
    ref2 = _reference_forward(x2, a2, params)
    assert out2.shape == (B2, 1), out2.shape
    assert jnp.allclose(out2, ref2, atol=5e-2, rtol=5e-2), (out2, ref2)

    print("KERNEL_OK")
</pallas_src>

<mosaic_0001>
module attributes {stable_mosaic.version = 11 : i64} {
  func.func @_qnet_kernel(%arg0: i32, %arg1: memref<16x12xbf16, #tpu.memory_space<vmem>>, %arg2: memref<16x4xbf16, #tpu.memory_space<vmem>>, %arg3: memref<12x128xbf16, #tpu.memory_space<vmem>>, %arg4: memref<4x128xbf16, #tpu.memory_space<vmem>>, %arg5: memref<1x128xf32, #tpu.memory_space<vmem>>, %arg6: memref<128x128xbf16, #tpu.memory_space<vmem>>, %arg7: memref<1x128xf32, #tpu.memory_space<vmem>>, %arg8: memref<1x128xbf16, #tpu.memory_space<vmem>>, %arg9: memref<1xf32, #tpu.memory_space<smem>>, %arg10: memref<1x1x16xf32, #tpu.memory_space<vmem>>) attributes {dimension_semantics = [#tpu.dimension_semantics<parallel>], iteration_bounds = array<i64: 1>, scalar_prefetch = 0 : i64, scratch_operands = 0 : i64, tpu.core_type = #tpu.core_type<tc>, window_params = [{transform_indices = @transform_0, window_bounds = array<i64: 16, 12>}, {transform_indices = @transform_1, window_bounds = array<i64: 16, 4>}, {pipeline_mode = #tpu.pipeline_mode<synchronous>, transform_indices = @transform_2, window_bounds = array<i64: 12, 128>}, {pipeline_mode = #tpu.pipeline_mode<synchronous>, transform_indices = @transform_3, window_bounds = array<i64: 4, 128>}, {pipeline_mode = #tpu.pipeline_mode<synchronous>, transform_indices = @transform_4, window_bounds = array<i64: 1, 128>}, {pipeline_mode = #tpu.pipeline_mode<synchronous>, transform_indices = @transform_5, window_bounds = array<i64: 128, 128>}, {pipeline_mode = #tpu.pipeline_mode<synchronous>, transform_indices = @transform_6, window_bounds = array<i64: 1, 128>}, {pipeline_mode = #tpu.pipeline_mode<synchronous>, transform_indices = @transform_7, window_bounds = array<i64: 1, 128>}, {transform_indices = @transform_8, window_bounds = array<i64: 1>}, {transform_indices = @transform_9, window_bounds = array<i64: 1, 1, 16>}]} {
    %c0 = arith.constant 0 : index
    %c0_0 = arith.constant 0 : index
    %0 = vector.load %arg1[%c0, %c0_0] : memref<16x12xbf16, #tpu.memory_space<vmem>>, vector<16x12xbf16>
    %c0_1 = arith.constant 0 : index
    %c0_2 = arith.constant 0 : index
    %1 = vector.load %arg3[%c0_1, %c0_2] : memref<12x128xbf16, #tpu.memory_space<vmem>>, vector<12x128xbf16>
    %cst = arith.constant dense<0.000000e+00> : vector<16x128xf32>
    %2 = tpu.matmul %0, %1, %cst {dimension_numbers = #tpu.dot_dimension_numbers<[1], [0], [0], [1], [0, 0, 1, 1], [], []>} : vector<16x12xbf16>, vector<12x128xbf16>, vector<16x128xf32> -> vector<16x128xf32>
    %c0_3 = arith.constant 0 : index
    %c0_4 = arith.constant 0 : index
    %3 = vector.load %arg2[%c0_3, %c0_4] : memref<16x4xbf16, #tpu.memory_space<vmem>>, vector<16x4xbf16>
    %c0_5 = arith.constant 0 : index
    %c0_6 = arith.constant 0 : index
    %4 = vector.load %arg4[%c0_5, %c0_6] : memref<4x128xbf16, #tpu.memory_space<vmem>>, vector<4x128xbf16>
    %cst_7 = arith.constant dense<0.000000e+00> : vector<16x128xf32>
    %5 = tpu.matmul %3, %4, %cst_7 {dimension_numbers = #tpu.dot_dimension_numbers<[1], [0], [0], [1], [0, 0, 1, 1], [], []>} : vector<16x4xbf16>, vector<4x128xbf16>, vector<16x128xf32> -> vector<16x128xf32>
    %6 = arith.addf %2, %5 : vector<16x128xf32>
    %c0_8 = arith.constant 0 : index
    %c0_9 = arith.constant 0 : index
    %7 = vector.load %arg5[%c0_8, %c0_9] : memref<1x128xf32, #tpu.memory_space<vmem>>, vector<1x128xf32>
    %8 = vector.broadcast %7 : vector<1x128xf32> to vector<16x128xf32>
    %9 = arith.addf %6, %8 : vector<16x128xf32>
    %cst_10 = arith.constant 0.000000e+00 : f32
    %10 = vector.broadcast %cst_10 : f32 to vector<16x128xf32>
    %11 = arith.maximumf %9, %10 : vector<16x128xf32>
    %12 = arith.truncf %11 : vector<16x128xf32> to vector<16x128xbf16>
    %c0_11 = arith.constant 0 : index
    %c0_12 = arith.constant 0 : index
    %13 = vector.load %arg6[%c0_11, %c0_12] : memref<128x128xbf16, #tpu.memory_space<vmem>>, vector<128x128xbf16>
    %cst_13 = arith.constant dense<0.000000e+00> : vector<16x128xf32>
    %14 = tpu.matmul %12, %13, %cst_13 {dimension_numbers = #tpu.dot_dimension_numbers<[1], [0], [0], [1], [0, 0, 1, 1], [], []>} : vector<16x128xbf16>, vector<128x128xbf16>, vector<16x128xf32> -> vector<16x128xf32>
    %c0_14 = arith.constant 0 : index
    %c0_15 = arith.constant 0 : index
    %15 = vector.load %arg7[%c0_14, %c0_15] : memref<1x128xf32, #tpu.memory_space<vmem>>, vector<1x128xf32>
    %16 = vector.broadcast %15 : vector<1x128xf32> to vector<16x128xf32>
    %17 = arith.addf %14, %16 : vector<16x128xf32>
    %cst_16 = arith.constant 0.000000e+00 : f32
    %18 = vector.broadcast %cst_16 : f32 to vector<16x128xf32>
    %19 = arith.maximumf %17, %18 : vector<16x128xf32>
    %c0_17 = arith.constant 0 : index
    %c0_18 = arith.constant 0 : index
    %20 = vector.load %arg8[%c0_17, %c0_18] : memref<1x128xbf16, #tpu.memory_space<vmem>>, vector<1x128xbf16>
    %21 = arith.truncf %19 : vector<16x128xf32> to vector<16x128xbf16>
    %cst_19 = arith.constant dense<0.000000e+00> : vector<1x16xf32>
    %22 = tpu.matmul %20, %21, %cst_19 {dimension_numbers = #tpu.dot_dimension_numbers<[1], [1], [0], [0], [0, 0, 1, 0], [], []>} : vector<1x128xbf16>, vector<16x128xbf16>, vector<1x16xf32> -> vector<1x16xf32>
    %c0_20 = arith.constant 0 : index
    %23 = memref.load %arg9[%c0_20] : memref<1xf32, #tpu.memory_space<smem>>
    %24 = vector.broadcast %23 : f32 to vector<1x16xf32>
    %25 = arith.addf %22, %24 : vector<1x16xf32>
    %26 = vector.shape_cast %25 : vector<1x16xf32> to vector<1x1x16xf32>
    %c0_21 = arith.constant 0 : index
    %c0_22 = arith.constant 0 : index
    %c0_23 = arith.constant 0 : index
    %27 = vector.load %arg10[%c0_21, %c0_22, %c0_23] : memref<1x1x16xf32, #tpu.memory_space<vmem>>, vector<1x1x16xf32>
    tpu.vector_store %arg10[%c0_21, %c0_22, %c0_23], %26 {strides = array<i32>} : memref<1x1x16xf32, #tpu.memory_space<vmem>>, vector<1x1x16xf32>,
    return
  }
  func.func @transform_0(%arg0: i32) -> (i32, i32) {
    %c0_i32 = arith.constant 0 : i32
    %c0_i32_0 = arith.constant 0 : i32
    return %arg0, %c0_i32 : i32, i32
  }
  func.func @transform_1(%arg0: i32) -> (i32, i32) {
    %c0_i32 = arith.constant 0 : i32
    %c0_i32_0 = arith.constant 0 : i32
    return %arg0, %c0_i32 : i32, i32
  }
  func.func @transform_2(%arg0: i32) -> (i32, i32) {
    %c0_i32 = arith.constant 0 : i32
    %c0_i32_0 = arith.constant 0 : i32
    %c0_i32_1 = arith.constant 0 : i32
    return %c0_i32, %c0_i32_0 : i32, i32
  }
  func.func @transform_3(%arg0: i32) -> (i32, i32) {
    %c0_i32 = arith.constant 0 : i32
    %c0_i32_0 = arith.constant 0 : i32
    %c0_i32_1 = arith.constant 0 : i32
    return %c0_i32, %c0_i32_0 : i32, i32
  }
  func.func @transform_4(%arg0: i32) -> (i32, i32) {
    %c0_i32 = arith.constant 0 : i32
    %c0_i32_0 = arith.constant 0 : i32
    %c0_i32_1 = arith.constant 0 : i32
    return %c0_i32, %c0_i32_0 : i32, i32
  }
  func.func @transform_5(%arg0: i32) -> (i32, i32) {
    %c0_i32 = arith.constant 0 : i32
    %c0_i32_0 = arith.constant 0 : i32
    %c0_i32_1 = arith.constant 0 : i32
    return %c0_i32, %c0_i32_0 : i32, i32
  }
  func.func @transform_6(%arg0: i32) -> (i32, i32) {
    %c0_i32 = arith.constant 0 : i32
    %c0_i32_0 = arith.constant 0 : i32
    %c0_i32_1 = arith.constant 0 : i32
    return %c0_i32, %c0_i32_0 : i32, i32
  }
  func.func @transform_7(%arg0: i32) -> (i32, i32) {
    %c0_i32 = arith.constant 0 : i32
    %c0_i32_0 = arith.constant 0 : i32
    %c0_i32_1 = arith.constant 0 : i32
    return %c0_i32, %c0_i32_0 : i32, i32
  }
  func.func @transform_8(%arg0: i32) -> i32 {
    %c0_i32 = arith.constant 0 : i32
    %c0_i32_0 = arith.constant 0 : i32
    return %c0_i32 : i32
  }
  func.func @transform_9(%arg0: i32) -> (i32, i32, i32) {
    %c0_i32 = arith.constant 0 : i32
    %c0_i32_0 = arith.constant 0 : i32
    %c0_i32_1 = arith.constant 0 : i32
    return %arg0, %c0_i32, %c0_i32_0 : i32, i32, i32
  }
}

</mosaic_0001>

<bundles_post_ra>
// kernel: tpu_custom_call.1
= control target key start
LH: loop header
LB: loop body
LE: loop exit
PB: predicated region body
PF: predicated region fallthrough
CT: control target
= control target key end

     0   :  { %15 = vsyncpa [#allocation4], 0  ;;  %s614_s0 = inlined_call_operand.vmem [shape: bf16[16,12], index: 0, kind: input, shape index: {}]   ;;  %s615_s1 = inlined_call_operand.vmem [shape: bf16[16,4], index: 1, kind: input, shape index: {}]   ;;  %s616_s2 = inlined_call_operand.hbm [shape: bf16[12,128], index: 2, kind: input, shape index: {}]   ;;  %s617_s3 = inlined_call_operand.vmem [shape: bf16[4,128], index: 3, kind: input, shape index: {}]   ;;  %s618_s4 = inlined_call_operand.vmem [shape: f32[1,128], index: 4, kind: input, shape index: {}]   ;;  %s619_s5 = inlined_call_operand.hbm [shape: bf16[128,128], index: 5, kind: input, shape index: {}]   ;;  %s620_s6 = inlined_call_operand.vmem [shape: f32[1,128], index: 6, kind: input, shape index: {}]   ;;  %s621_s7 = inlined_call_operand.vmem [shape: bf16[1,128], index: 7, kind: input, shape index: {}]   ;;  %s622_s8 = inlined_call_operand.<no memory space> [shape: f32[1], index: 8, kind: input, shape index: {}]   ;;  %s623_s9 = inlined_call_operand.hbm [shape: f32[1,1,16], index: 9, kind: output, shape index: {}]  }
   0x1   :  { %16 = vsyncpa [#allocation7], 0 }
   0x2   :  { %17 = vsyncpa [#allocation5], 0  ;;  %s523_s30 = smov [#allocation3]  }
   0x3   :  { %s27_s10 = sshll.u32 %s523_s30, 4  ;;  %s28_s10 = int_to_ptr.vmem [resolvable:$true] %s27_s10 }
   0x4   :  { %s465_s11 = scalar_lea.vmem %s28_s10, 128  ;;  %p470_p1 = scmp.lt.s32.totalorder %s28_s10, %s28_s10 }
   0x5   :  { %p466_p0 = scmp.ne.s32.totalorder %s28_s10, %s465_s11  ;;  %p471_p2 = scmp.lt.s32.totalorder %s465_s11, %s465_s11 }
   0x7   :  { %p472_p3 = por %p471_p2, %p470_p1 }
   0x9   :  { %p473_p4 = pnand %p472_p3, %p466_p0 }
   0xb   :  { %476 = shalt.err (!%p473_p4)
}
   0xc   :  { %s524_s12 = smov 64   ;;  %s525_s13 = smov 4  }
   0xd   :  { %33 = dma.hbm_to_vmem [thread:$0]  %s616_s2, 128, %s28_s10, [#allocation4], %s524_s12, %s524_s12, %s525_s13  }
   0xe   :  { %s526_s16 = smov [#allocation6]  }
   0xf   :  { %s43_s17 = sshll.u32 %s526_s16, 4  ;;  %s44_s17 = int_to_ptr.vmem [resolvable:$true] %s43_s17 }
  0x10   :  { %s485_s18 = scalar_lea.vmem %s44_s17, 1024  ;;  %p490_p6 = scmp.lt.s32.totalorder %s44_s17, %s44_s17 }
  0x11   :  { %p486_p5 = scmp.ne.s32.totalorder %s44_s17, %s485_s18  ;;  %p491_p7 = scmp.lt.s32.totalorder %s485_s18, %s485_s18 }
  0x13   :  { %p492_p8 = por %p491_p7, %p490_p6 }
  0x15   :  { %p493_p9 = pnand %p492_p8, %p486_p5 }
  0x17   :  { %496 = shalt.err (!%p493_p9)
}
  0x18   :  { %49 = dma.hbm_to_vmem [thread:$0]  %s619_s5, 1024, %s44_s17, [#allocation7], %s524_s12, %s524_s12, %s525_s13  }
  0x19   :  { %517 = dma.done.wait [#allocation4], 128  }
  0x1a   :  { %518 = vsyncadd [#allocation4], 4294967168 }
  0x1b   :  { %519 = dma.done.wait [#allocation7], 1024  }
  0x1c   :  { %520 = vsyncadd [#allocation7], 4294966272  ;;  %v527_v0 = vmov 0.0   ;;  %vm528_vm0 = vmmov 0   ;;  %vm79_vm1 = vcmask 1041408   ;;  %vm75_vm2 = vcmask 31744  }
  0x1d   :  { %401 = vmatprep.subr.bf16.mxu1 %v527_v0  ;;  %403 = vmatprep.mubr.msk.bf16.mxu1 %vm528_vm0, %v527_v0  ;;  %vm138_vm3 = vcmask 1045504   ;;  %v69_v1 = vld [vmem:[%s617_s3] sm:$0x3]  ;;  %v450_v7 = vld [vmem:[#allocation6 + $0x30] sm:$0xff]   ;;  %vm134_vm4 = vcmask 97280   ;;  %v451_v9 = vld [vmem:[#allocation6 + $0x28] sm:$0xff]   ;;  %v312_v42 = vstv %s622_s8 }
  0x1e   :  { %413 = vmatprep.subr.bf16.mxu0 %v527_v0  ;;  %429 = vmatprep.mubr.msk.bf16.mxu0 %vm528_vm0, %v527_v0  ;;  %v81_v2 = vsel %vm79_vm1, %v69_v1, 0  ;;  %v446_v3 = vld [vmem:[%s615_s1] sm:$0xff]   ;;  %v452_v10 = vld [vmem:[#allocation6 + $0x20] sm:$0xff]   ;;  %v454_v12 = vld [vmem:[#allocation6 + $0x10] sm:$0xff]   ;;  %vm353_vm5 = vcmask 122880  }
  0x1f   :  { %402 = vmatpush3.bf16.msra.mxu1 %v81_v2  ;;  %v447_v4 = vld [vmem:[#allocation3] sm:$0x3f]   ;;  %v455_v13 = vld [vmem:[#allocation6 + $0x8] sm:$0xff]   ;;  %v456_v14 = vld [vmem:[#allocation6] sm:$0xff]  }
  0x20   :  { %407 = vmatprep.subr.bf16.mxu1 %v527_v0  ;;  %v140_v5 = vsel %vm138_vm3, %v447_v4, 0  ;;  %v449_v6 = vld [vmem:[#allocation6 + $0x38] sm:$0xff]  }
  0x21   :  { %414 = vmatpush3.bf16.msra.mxu0 %v449_v6  ;;  %v448_v8 = vld [vmem:[%s614_s0] sm:$0xff]  }
  0x22   :  { %404 = vmatmul.mubr.msk.bf16.vlgmr.msra.gmra.mxu1 %vm75_vm2, %v446_v3  ;;  %415 = vmatprep.subr.bf16.mxu0 %v527_v0  ;;  %v453_v11 = vld [vmem:[#allocation6 + $0x18] sm:$0xff]  }
  0x23   :  { %408 = vmatpush3.bf16.msra.mxu1 %v140_v5  ;;  %409 = vmatprep.mubr.msk.bf16.mxu1 %vm528_vm0, %v527_v0  ;;  %v376_v21 = vld [vmem:[%s618_s4] ss:$0 sm:$0xff] }
  0x24   :  { %433 = vmatprep.subr.bf16.mxu1 %v527_v0  ;;  %v377_v31 = vld [vmem:[%s620_s6] ss:$0 sm:$0xff]  ;;  %s529_s6 = smov [#allocation8]  }
  0x25   :  { %416 = vmatpush3.bf16.msra.mxu0 %v450_v7  ;;  %v309_v41 = vld [vmem:[%s621_s7] sm:$0x1]  ;;  %s361_s29 = sshll.u32 %s529_s6, 4  ;;  %s362_s29 = int_to_ptr.vmem [resolvable:$true] %s361_s29 }
  0x26   :  { %417 = vmatprep.subr.bf16.mxu0 %v527_v0  ;;  %s497_s30 = scalar_lea.vmem %s362_s29, 16  ;;  %s501_s10 = scalar_lea.vmem %s362_s29, 32 }
  0x27   :  { %p498_p10 = scmp.ne.s32.totalorder %s362_s29, %s497_s30  ;;  %p502_p11 = scmp.lt.s32.totalorder %s362_s29, %s362_s29 }
  0x28   :  { %p503_p12 = scmp.lt.s32.totalorder %s501_s10, %s497_s30 }
  0x29   :  { %418 = vmatpush3.bf16.msra.mxu0 %v451_v9 }
  0x2a   :  { %410 = vmatmul.mubr.msk.bf16.vlgmr.msra.gmra.mxu1 %vm134_vm4, %v448_v8  ;;  %419 = vmatprep.subr.bf16.mxu0 %v527_v0  ;;  %p504_p13 = por %p503_p12, %p502_p11 }
  0x2b   :  { %435 = vmatprep.mubr.msk.bf16.mxu1 %vm528_vm0, %v527_v0 }
  0x2c   :  { %p505_p0 = pnand %p504_p13, %p498_p10 }
  0x2d   :  { %420 = vmatpush3.bf16.msra.mxu0 %v452_v10 }
  0x2e   :  { %421 = vmatprep.subr.bf16.mxu0 %v527_v0 }
  0x31   :  { %422 = vmatpush3.bf16.msra.mxu0 %v453_v11 }
  0x32   :  { %423 = vmatprep.subr.bf16.mxu0 %v527_v0 }
  0x35   :  { %424 = vmatpush3.bf16.msra.mxu0 %v454_v12 }
  0x36   :  { %425 = vmatprep.subr.bf16.mxu0 %v527_v0 }
  0x39   :  { %426 = vmatpush3.bf16.msra.mxu0 %v455_v13 }
  0x3a   :  { %427 = vmatprep.subr.bf16.mxu0 %v527_v0 }
  0x3d   :  { %428 = vmatpush3.bf16.msra.mxu0 %v456_v14 }
  0xe2   :  { %v117_v15 = vpop.f32.mrf.mxu1 }
  0xe4   :  { %v405_v16 = vpop.f32.mrf.mxu1 }
  0xe6   :  { %v120_v17 = vpop.f32.mrf.mxu1 }
  0xe8   :  { %v406_v18 = vpop.f32.mrf.mxu1 }
  0xea   :  { %v176_v19 = vpop.f32.mrf.mxu1 }
  0xeb   :  { %v177_v20 = vadd.f32 %v176_v19, %v117_v15 }
  0xec   :  { %v411_v22 = vpop.f32.mrf.mxu1 }
  0xed   :  { %v190_v24 = vadd.f32 %v376_v21, %v177_v20 }
  0xee   :  { %v179_v23 = vpop.f32.mrf.mxu1 }
  0xef   :  { %v180_v25 = vadd.f32 %v179_v23, %v120_v17  ;;  %v192_v28 = vmax.f32 %v190_v24, 0.0 }
  0xf0   :  { %v412_v26 = vpop.f32.mrf.mxu1 }
  0xf1   :  { %v191_v27 = vadd.f32 %v376_v21, %v180_v25 }
  0xf3   :  { %v193_v29 = vmax.f32 %v191_v27, 0.0 }
  0xf5   :  { %v194_v30 = vpack.c.bf16 %v193_v29, %v192_v28 }
  0xf7   :  { %430 = vmatmul.mubr.bf16.vlgmr.msra.gmra.mxu0 %v194_v30 }
 0x1b7   :  { %v300_v32 = vpop.f32.mrf.mxu0 }
 0x1b8   :  { %v301_v34 = vadd.f32 %v377_v31, %v300_v32 }
 0x1b9   :  { %v431_v33 = vpop.f32.mrf.mxu0 }
 0x1ba   :  { %v307_v38 = vmax.f32 %v301_v34, 0.0 }
 0x1bb   :  { %v303_v35 = vpop.f32.mrf.mxu0 }
 0x1bc   :  { %v304_v36 = vadd.f32 %v377_v31, %v303_v35 }
 0x1bd   :  { %v432_v37 = vpop.f32.mrf.mxu0 }
 0x1be   :  { %v308_v39 = vmax.f32 %v304_v36, 0.0 }
 0x1c0   :  { %v310_v40 = vpack.c.bf16 %v308_v39, %v307_v38 }
 0x1c2   :  { %434 = vmatpush3.bf16.xpose.msra.mxu1 %v310_v40 }
 0x1c9   :  { %436 = vmatmul.mubr.bf16.vlgmr.msra.gmra.mxu1 %v309_v41 }
 0x289   :  { %v347_v43 = vpop.f32.mrf.mxu1 }
 0x28a   :  { %v348_v44 = vadd.f32 %v347_v43, %v312_v42 }
 0x28b   :  { %v437_v45 = vpop.f32.mrf.mxu1 }
 0x28c   :  { %354 = vst.msk [vmem:[#allocation8] sm:$0x1] %vm353_vm5, %v348_v44 }
 0x28d   :  { %v350_v46 = vpop.f32.mrf.mxu1 }
 0x28e   :  { %508 = shalt.err (!%p505_p0)
}
 0x28f   :  { %364 = dma.vmem_to_hbm [thread:$0]  %s362_s29, 16, %s623_s9, [#allocation5]   ;;  %v438_v47 = vpop.f32.mrf.mxu1 }
 0x290   :  { %521 = dma.done.wait [#allocation5], 16  }
 0x291   :  { %522 = vsyncadd [#allocation5], 4294967280 }
 0x292   :  { %368 = vsyncpa [#allocation4], 1 }
 0x293   :  { %369 = vsyncpa [#allocation7], 1 }
 0x294   :  { %370 = vsyncpa [#allocation5], 1 }

</bundles_post_ra>
